<compile_context>
chip_gen: v5e
topology: v5e:2x2
jax: 0.10.0
libtpu: 0.0.40
codegen_flags: <defaults>
</compile_context>

<pallas_src>
import functools

import jax
import jax.numpy as jnp
from jax import lax
from jax.experimental import pallas as pl
from jax.experimental.pallas import tpu as pltpu
from jax.scipy.linalg import cho_factor, cho_solve

EPS = 1e-4          # module's eps (QP regularization strength)
RHO = 1.0           # ADMM penalty parameter
ALPHA = 1.6         # ADMM over-relaxation (same fixed point as plain ADMM)
ADMM_ITERS = 1000   # fixed iteration count
UNROLL = 4          # in-kernel loop unroll (amortizes fori overhead only; the
                    # iterations are serially dependent, so keep it small)
LANE = 128          # f32 lane width


def _round_up(x, k):
    return ((x + k - 1) // k) * k


def _tpu_vmem_and_cores():
    """Returns (usable per-TensorCore VMEM bytes, #TCs a 'parallel' grid axis spans)."""
    kind = ""
    try:
        kind = jax.devices()[0].device_kind.lower()
    except Exception:
        pass
    if "v7" in kind:                            # 2 TCs / chip, 64 MiB VMEM per TC
        phys, cores = 64 * 2**20, 2
    elif "v2" in kind or "v3" in kind:          # ancient: tiny VMEM
        phys, cores = 16 * 2**20, 1
    elif "v6" in kind:                          # v6e: 1 TC, 128 MiB
        phys, cores = 128 * 2**20, 1
    elif "lite" in kind or "v5e" in kind:       # v5e: 1 TC, 128 MiB
        phys, cores = 128 * 2**20, 1
    elif "v4" in kind or "v5" in kind:          # v4 / v5p megacore: 2 TCs, 128 MiB each
        phys, cores = 128 * 2**20, 2
    else:                                       # unknown: conservative
        phys, cores = 64 * 2**20, 1
    return int(0.85 * phys), cores              # headroom for compiler scratch


def _admm_dual_kernel(q_ref, p_ref, h_ref, v_ref, *, beta, iters, unroll):
    """Slack/dual-space ADMM; outputs v = h - s - u (enough to recover z).

    q_ref : (TB, m_pad)  alpha * x Minv G'      (per batch tile)
    p_ref : (m_pad, m_pad)  alpha * rho * G Minv G'  (grid-resident)
    h_ref : (1, m_pad)   inequality rhs             (grid-resident)
    v_ref : (TB, m_pad)  output v = t - u = h - s - u at the final iterate
    """
    q = q_ref[...]
    P = p_ref[...]
    # Hoist the (1, m) -> (TB, m) broadcast out of the loop (no CSE in-loop).
    hb = jnp.broadcast_to(h_ref[...], q.shape)

    def one_iter(t, u):
        w = t - u
        r = q + jnp.dot(w, P, preferred_element_type=jnp.float32) + beta * t
        ru = r + u
        t_new = jnp.minimum(hb, ru)          # == h - max(0, h - ru)  (slack projection)
        u_new = ru - t_new                   # scaled dual update
        return t_new, u_new

    def body(_, carry):
        t, u = carry
        for _ in range(unroll):              # static unroll inside the fori body
            t, u = one_iter(t, u)
        return (t, u)

    t = hb                                   # t = h - s with s = 0
    u = jnp.zeros_like(q)
    t, u = lax.fori_loop(0, iters // unroll, body, (t, u))
    for _ in range(iters % unroll):          # static remainder (usually 0)
        t, u = one_iter(t, u)

    v_ref[...] = t - u


def build_constraints(N):
    """Deterministic reconstruction of PolicyLP.__init__'s G, h (indices_A=None)."""
    n = N * N
    eye_n = jnp.eye(N, dtype=jnp.float32)
    ones_row = jnp.ones((1, N), dtype=jnp.float32)
    ROWlhs = jnp.kron(eye_n, ones_row)       # row sums of z.view(N, N)
    COLlhs = jnp.kron(ones_row, eye_n)       # col sums of z.view(N, N)
    POSlhs = -jnp.eye(n, dtype=jnp.float32)  # -z <= 0
    G = jnp.concatenate([ROWlhs, COLlhs, POSlhs], axis=0)
    h = jnp.concatenate(
        [jnp.ones((N,), jnp.float32),
         jnp.ones((N,), jnp.float32),
         jnp.zeros((n,), jnp.float32)], axis=0)
    return G, h


def policy_lp_forward(x, N, eps=EPS, rho=RHO, alpha=ALPHA, iters=ADMM_ITERS):
    """JAX/Pallas equivalent of PolicyLP(N).forward(x); x: (B, N*N) -> (B, N, N)."""
    x = x.astype(jnp.float32)
    B = x.shape[0]
    n = N * N
    G, h = build_constraints(N)
    m = G.shape[0]
    m_pad = _round_up(m, LANE)               # lane-dense vregs / unmasked stores

    # ---- Plain-XLA precompute (data-independent M; Cholesky, no explicit inverse).
    M = eps * jnp.eye(n, dtype=jnp.float32) + rho * (G.T @ G)     # SPD
    chol = cho_factor(M)
    GMinv = cho_solve(chol, G.T).T                                # (m, n) = G Minv
    P = rho * (GMinv @ G.T)                                       # (m, m), symmetric
    q0 = x @ GMinv.T                                              # (B, m) = x Minv G'

    # Fold the over-relaxation factor into q/P (shortens the in-loop VPU chain).
    alpha = float(alpha)
    beta = 1.0 - alpha
    Pk = jnp.zeros((m_pad, m_pad), jnp.float32).at[:m, :m].set(alpha * P)
    hk = jnp.zeros((1, m_pad), jnp.float32).at[0, :m].set(h)
    qk = jnp.zeros((B, m_pad), jnp.float32).at[:, :m].set(alpha * q0)
    # Padded coordinates (zero q/h, zero P rows/cols) are exact fixed points of
    # the iteration, so they never perturb the real coordinates.

    vmem_budget, num_cores = _tpu_vmem_and_cores()

    def launch(single_buffer_const):
        p_bufs = 1 if single_buffer_const else 2
        # VMEM plan per grid step: P + h resident, q / v double-buffered,
        # ~8 live (TB, m_pad) f32 temporaries (q, hb, t, u, w, r, ru + slack).
        const_bytes = p_bufs * (m_pad * m_pad + m_pad) * 4
        row_bytes = (2 + 2 + 8) * m_pad * 4
        avail = vmem_budget - const_bytes - (2 << 20)
        if avail < 8 * row_bytes:
            raise ValueError(f"m_pad={m_pad}: P does not fit the VMEM budget")
        tb_cap = max(8, (avail // row_bytes) // 8 * 8)

        b_pad8 = _round_up(B, 8)
        # >=1 tile per TensorCore when there are enough rows (v7x / megacore);
        # a single big tile on single-TC chips (v5e/v6e), since a sequential
        # grid only repeats the latency-bound 1000-iteration chain.
        tiles = max(pl.cdiv(b_pad8, tb_cap), min(num_cores, b_pad8 // 8))
        tb = _round_up(pl.cdiv(b_pad8, tiles), 8)    # minimal batch padding
        b_pad = tb * tiles
        q_pad = jnp.pad(qk, ((0, b_pad - B), (0, 0)))

        const_kwargs = {}
        if single_buffer_const:
            # Grid-constant operands: double-buffering them is pure VMEM waste.
            const_kwargs = dict(pipeline_mode=pl.Buffered(1))
        in_specs = [
            pl.BlockSpec((tb, m_pad), lambda i: (i, 0)),                  # q (batch-tiled)
            pl.BlockSpec((m_pad, m_pad), lambda i: (0, 0), **const_kwargs),  # P (resident)
            pl.BlockSpec((1, m_pad), lambda i: (0, 0), **const_kwargs),      # h (resident)
        ]
        needed = const_bytes + tb * row_bytes + (2 << 20)
        vmem_limit = int(min(max(needed, 32 << 20), vmem_budget))

        kernel = functools.partial(_admm_dual_kernel, beta=beta,
                                   iters=int(iters), unroll=UNROLL)
        cost = pl.CostEstimate(
            flops=2 * b_pad * m_pad * m_pad * int(iters),
            transcendentals=0,
            bytes_accessed=4 * (2 * b_pad * m_pad + m_pad * m_pad + m_pad))

        return pl.pallas_call(
            kernel,
            out_shape=jax.ShapeDtypeStruct((b_pad, m_pad), jnp.float32),
            grid=(tiles,),
            in_specs=in_specs,
            out_specs=pl.BlockSpec((tb, m_pad), lambda i: (i, 0)),
            compiler_params=pltpu.CompilerParams(
                dimension_semantics=("parallel",),
                vmem_limit_bytes=vmem_limit),
            cost_estimate=cost,
        )(q_pad, Pk, hk)

    try:
        v = launch(True)       # single-buffered grid-constant P / h
    except Exception:
        v = launch(False)      # fallback if this JAX rejects pipeline_mode / Buffered(1)

    v = v[:B, :m]              # drop batch / lane padding

    # ---- One-time primal recovery outside the kernel (Minv never in VMEM):
    #      z = Minv (x + rho G'(h - s - u))
    z = cho_solve(chol, (x + rho * (v @ G)).T).T
    z = jnp.maximum(z, 0.0)    # feasibility clamp (qpth solution is nonnegative)

    return z.reshape(B, N, N)  # matches PyTorch's x.view(-1, N, N).float()


if __name__ == "__main__":
    N = 4          # matching-matrix side -> n = 16 QP variables, m = 24 constraints
    B = 2          # batch size
    key = jax.random.PRNGKey(0)
    x = jax.random.normal(key, (B, N * N), dtype=jnp.float32)

    out = policy_lp_forward(x, N)
    jax.block_until_ready(out)
    assert out.shape == (B, N, N)
    assert bool(jnp.all(jnp.isfinite(out)))
    print("KERNEL_OK")
</pallas_src>

<mosaic_0001>
module attributes {stable_mosaic.version = 11 : i64} {
  func.func @_admm_dual_kernel(%arg0: i32, %arg1: memref<8x128xf32, #tpu.memory_space<vmem>>, %arg2: memref<128x128xf32, #tpu.memory_space<vmem>>, %arg3: memref<1x128xf32, #tpu.memory_space<vmem>>, %arg4: memref<8x128xf32, #tpu.memory_space<vmem>>) attributes {dimension_semantics = [#tpu.dimension_semantics<parallel>], iteration_bounds = array<i64: 1>, scalar_prefetch = 0 : i64, scratch_operands = 0 : i64, tpu.core_type = #tpu.core_type<tc>, window_params = [{transform_indices = @transform_0, window_bounds = array<i64: 8, 128>}, {pipeline_mode = #tpu.pipeline_mode<synchronous>, transform_indices = @transform_1, window_bounds = array<i64: 128, 128>}, {pipeline_mode = #tpu.pipeline_mode<synchronous>, transform_indices = @transform_2, window_bounds = array<i64: 1, 128>}, {transform_indices = @transform_3, window_bounds = array<i64: 8, 128>}]} {
    %c0 = arith.constant 0 : index
    %c0_0 = arith.constant 0 : index
    %0 = vector.load %arg1[%c0, %c0_0] : memref<8x128xf32, #tpu.memory_space<vmem>>, vector<8x128xf32>
    %c0_1 = arith.constant 0 : index
    %c0_2 = arith.constant 0 : index
    %1 = vector.load %arg2[%c0_1, %c0_2] : memref<128x128xf32, #tpu.memory_space<vmem>>, vector<128x128xf32>
    %c0_3 = arith.constant 0 : index
    %c0_4 = arith.constant 0 : index
    %2 = vector.load %arg3[%c0_3, %c0_4] : memref<1x128xf32, #tpu.memory_space<vmem>>, vector<1x128xf32>
    %3 = vector.shape_cast %2 : vector<1x128xf32> to vector<1x128xf32>
    %4 = vector.broadcast %3 : vector<1x128xf32> to vector<8x128xf32>
    %cst = arith.constant 0.000000e+00 : f32
    %5 = vector.broadcast %cst : f32 to vector<8x128xf32>
    %c0_i32 = arith.constant 0 : i32
    %c250_i32 = arith.constant 250 : i32
    %6 = arith.addi %c0_i32, %c250_i32 : i32
    %c1_i32 = arith.constant 1 : i32
    %7:2 = scf.for %arg5 = %c0_i32 to %6 step %c1_i32 iter_args(%arg6 = %4, %arg7 = %5) -> (vector<8x128xf32>, vector<8x128xf32>)  : i32 {
      %10 = arith.subf %arg6, %arg7 : vector<8x128xf32>
      %cst_7 = arith.constant dense<0.000000e+00> : vector<8x128xf32>
      %11 = tpu.matmul %10, %1, %cst_7 {dimension_numbers = #tpu.dot_dimension_numbers<[1], [0], [0], [1], [0, 0, 1, 1], [], []>} : vector<8x128xf32>, vector<128x128xf32>, vector<8x128xf32> -> vector<8x128xf32>
      %12 = arith.addf %0, %11 : vector<8x128xf32>
      %cst_8 = arith.constant -6.000000e-01 : f32
      %13 = vector.broadcast %cst_8 : f32 to vector<8x128xf32>
      %14 = arith.mulf %13, %arg6 : vector<8x128xf32>
      %15 = arith.addf %12, %14 : vector<8x128xf32>
      %16 = arith.addf %15, %arg7 : vector<8x128xf32>
      %17 = arith.minimumf %4, %16 : vector<8x128xf32>
      %18 = arith.subf %16, %17 : vector<8x128xf32>
      %19 = arith.subf %17, %18 : vector<8x128xf32>
      %cst_9 = arith.constant dense<0.000000e+00> : vector<8x128xf32>
      %20 = tpu.matmul %19, %1, %cst_9 {dimension_numbers = #tpu.dot_dimension_numbers<[1], [0], [0], [1], [0, 0, 1, 1], [], []>} : vector<8x128xf32>, vector<128x128xf32>, vector<8x128xf32> -> vector<8x128xf32>
      %21 = arith.addf %0, %20 : vector<8x128xf32>
      %cst_10 = arith.constant -6.000000e-01 : f32
      %22 = vector.broadcast %cst_10 : f32 to vector<8x128xf32>
      %23 = arith.mulf %22, %17 : vector<8x128xf32>
      %24 = arith.addf %21, %23 : vector<8x128xf32>
      %25 = arith.addf %24, %18 : vector<8x128xf32>
      %26 = arith.minimumf %4, %25 : vector<8x128xf32>
      %27 = arith.subf %25, %26 : vector<8x128xf32>
      %28 = arith.subf %26, %27 : vector<8x128xf32>
      %cst_11 = arith.constant dense<0.000000e+00> : vector<8x128xf32>
      %29 = tpu.matmul %28, %1, %cst_11 {dimension_numbers = #tpu.dot_dimension_numbers<[1], [0], [0], [1], [0, 0, 1, 1], [], []>} : vector<8x128xf32>, vector<128x128xf32>, vector<8x128xf32> -> vector<8x128xf32>
      %30 = arith.addf %0, %29 : vector<8x128xf32>
      %cst_12 = arith.constant -6.000000e-01 : f32
      %31 = vector.broadcast %cst_12 : f32 to vector<8x128xf32>
      %32 = arith.mulf %31, %26 : vector<8x128xf32>
      %33 = arith.addf %30, %32 : vector<8x128xf32>
      %34 = arith.addf %33, %27 : vector<8x128xf32>
      %35 = arith.minimumf %4, %34 : vector<8x128xf32>
      %36 = arith.subf %34, %35 : vector<8x128xf32>
      %37 = arith.subf %35, %36 : vector<8x128xf32>
      %cst_13 = arith.constant dense<0.000000e+00> : vector<8x128xf32>
      %38 = tpu.matmul %37, %1, %cst_13 {dimension_numbers = #tpu.dot_dimension_numbers<[1], [0], [0], [1], [0, 0, 1, 1], [], []>} : vector<8x128xf32>, vector<128x128xf32>, vector<8x128xf32> -> vector<8x128xf32>
      %39 = arith.addf %0, %38 : vector<8x128xf32>
      %cst_14 = arith.constant -6.000000e-01 : f32
      %40 = vector.broadcast %cst_14 : f32 to vector<8x128xf32>
      %41 = arith.mulf %40, %35 : vector<8x128xf32>
      %42 = arith.addf %39, %41 : vector<8x128xf32>
      %43 = arith.addf %42, %36 : vector<8x128xf32>
      %44 = arith.minimumf %4, %43 : vector<8x128xf32>
      %45 = arith.subf %43, %44 : vector<8x128xf32>
      scf.yield %44, %45 : vector<8x128xf32>, vector<8x128xf32>
    }
    %8 = arith.subf %7#0, %7#1 : vector<8x128xf32>
    %c0_5 = arith.constant 0 : index
    %c0_6 = arith.constant 0 : index
    %9 = vector.load %arg4[%c0_5, %c0_6] : memref<8x128xf32, #tpu.memory_space<vmem>>, vector<8x128xf32>
    tpu.vector_store %arg4[%c0_5, %c0_6], %8 {strides = array<i32>} : memref<8x128xf32, #tpu.memory_space<vmem>>, vector<8x128xf32>,
    return
  }
  func.func @transform_0(%arg0: i32) -> (i32, i32) {
    %c0_i32 = arith.constant 0 : i32
    %c0_i32_0 = arith.constant 0 : i32
    return %arg0, %c0_i32 : i32, i32
  }
  func.func @transform_1(%arg0: i32) -> (i32, i32) {
    %c0_i32 = arith.constant 0 : i32
    %c0_i32_0 = arith.constant 0 : i32
    %c0_i32_1 = arith.constant 0 : i32
    return %c0_i32, %c0_i32_0 : i32, i32
  }
  func.func @transform_2(%arg0: i32) -> (i32, i32) {
    %c0_i32 = arith.constant 0 : i32
    %c0_i32_0 = arith.constant 0 : i32
    %c0_i32_1 = arith.constant 0 : i32
    return %c0_i32, %c0_i32_0 : i32, i32
  }
  func.func @transform_3(%arg0: i32) -> (i32, i32) {
    %c0_i32 = arith.constant 0 : i32
    %c0_i32_0 = arith.constant 0 : i32
    return %arg0, %c0_i32 : i32, i32
  }
}

module attributes {stable_mosaic.version = 11 : i64} {
  func.func @_admm_dual_kernel(%arg0: i32, %arg1: memref<8x128xf32, #tpu.memory_space<vmem>>, %arg2: memref<128x128xf32, #tpu.memory_space<vmem>>, %arg3: memref<1x128xf32, #tpu.memory_space<vmem>>, %arg4: memref<8x128xf32, #tpu.memory_space<vmem>>) attributes {dimension_semantics = [#tpu.dimension_semantics<parallel>], iteration_bounds = array<i64: 1>, scalar_prefetch = 0 : i64, scratch_operands = 0 : i64, tpu.core_type = #tpu.core_type<tc>, window_params = [{transform_indices = @transform_0, window_bounds = array<i64: 8, 128>}, {pipeline_mode = #tpu.pipeline_mode<synchronous>, transform_indices = @transform_1, window_bounds = array<i64: 128, 128>}, {pipeline_mode = #tpu.pipeline_mode<synchronous>, transform_indices = @transform_2, window_bounds = array<i64: 1, 128>}, {transform_indices = @transform_3, window_bounds = array<i64: 8, 128>}]} {
    %c0 = arith.constant 0 : index
    %c0_0 = arith.constant 0 : index
    %0 = vector.load %arg1[%c0, %c0_0] : memref<8x128xf32, #tpu.memory_space<vmem>>, vector<8x128xf32>
    %c0_1 = arith.constant 0 : index
    %c0_2 = arith.constant 0 : index
    %1 = vector.load %arg2[%c0_1, %c0_2] : memref<128x128xf32, #tpu.memory_space<vmem>>, vector<128x128xf32>
    %c0_3 = arith.constant 0 : index
    %c0_4 = arith.constant 0 : index
    %2 = vector.load %arg3[%c0_3, %c0_4] : memref<1x128xf32, #tpu.memory_space<vmem>>, vector<1x128xf32>
    %3 = vector.shape_cast %2 : vector<1x128xf32> to vector<1x128xf32>
    %4 = vector.broadcast %3 : vector<1x128xf32> to vector<8x128xf32>
    %cst = arith.constant 0.000000e+00 : f32
    %5 = vector.broadcast %cst : f32 to vector<8x128xf32>
    %c0_i32 = arith.constant 0 : i32
    %c250_i32 = arith.constant 250 : i32
    %6 = arith.addi %c0_i32, %c250_i32 : i32
    %c1_i32 = arith.constant 1 : i32
    %7:2 = scf.for %arg5 = %c0_i32 to %6 step %c1_i32 iter_args(%arg6 = %4, %arg7 = %5) -> (vector<8x128xf32>, vector<8x128xf32>)  : i32 {
      %10 = arith.subf %arg6, %arg7 : vector<8x128xf32>
      %cst_7 = arith.constant dense<0.000000e+00> : vector<8x128xf32>
      %11 = tpu.matmul %10, %1, %cst_7 {dimension_numbers = #tpu.dot_dimension_numbers<[1], [0], [0], [1], [0, 0, 1, 1], [], []>} : vector<8x128xf32>, vector<128x128xf32>, vector<8x128xf32> -> vector<8x128xf32>
      %12 = arith.addf %0, %11 : vector<8x128xf32>
      %cst_8 = arith.constant -6.000000e-01 : f32
      %13 = vector.broadcast %cst_8 : f32 to vector<8x128xf32>
      %14 = arith.mulf %13, %arg6 : vector<8x128xf32>
      %15 = arith.addf %12, %14 : vector<8x128xf32>
      %16 = arith.addf %15, %arg7 : vector<8x128xf32>
      %17 = arith.minimumf %4, %16 : vector<8x128xf32>
      %18 = arith.subf %16, %17 : vector<8x128xf32>
      %19 = arith.subf %17, %18 : vector<8x128xf32>
      %cst_9 = arith.constant dense<0.000000e+00> : vector<8x128xf32>
      %20 = tpu.matmul %19, %1, %cst_9 {dimension_numbers = #tpu.dot_dimension_numbers<[1], [0], [0], [1], [0, 0, 1, 1], [], []>} : vector<8x128xf32>, vector<128x128xf32>, vector<8x128xf32> -> vector<8x128xf32>
      %21 = arith.addf %0, %20 : vector<8x128xf32>
      %cst_10 = arith.constant -6.000000e-01 : f32
      %22 = vector.broadcast %cst_10 : f32 to vector<8x128xf32>
      %23 = arith.mulf %22, %17 : vector<8x128xf32>
      %24 = arith.addf %21, %23 : vector<8x128xf32>
      %25 = arith.addf %24, %18 : vector<8x128xf32>
      %26 = arith.minimumf %4, %25 : vector<8x128xf32>
      %27 = arith.subf %25, %26 : vector<8x128xf32>
      %28 = arith.subf %26, %27 : vector<8x128xf32>
      %cst_11 = arith.constant dense<0.000000e+00> : vector<8x128xf32>
      %29 = tpu.matmul %28, %1, %cst_11 {dimension_numbers = #tpu.dot_dimension_numbers<[1], [0], [0], [1], [0, 0, 1, 1], [], []>} : vector<8x128xf32>, vector<128x128xf32>, vector<8x128xf32> -> vector<8x128xf32>
      %30 = arith.addf %0, %29 : vector<8x128xf32>
      %cst_12 = arith.constant -6.000000e-01 : f32
      %31 = vector.broadcast %cst_12 : f32 to vector<8x128xf32>
      %32 = arith.mulf %31, %26 : vector<8x128xf32>
      %33 = arith.addf %30, %32 : vector<8x128xf32>
      %34 = arith.addf %33, %27 : vector<8x128xf32>
      %35 = arith.minimumf %4, %34 : vector<8x128xf32>
      %36 = arith.subf %34, %35 : vector<8x128xf32>
      %37 = arith.subf %35, %36 : vector<8x128xf32>
      %cst_13 = arith.constant dense<0.000000e+00> : vector<8x128xf32>
      %38 = tpu.matmul %37, %1, %cst_13 {dimension_numbers = #tpu.dot_dimension_numbers<[1], [0], [0], [1], [0, 0, 1, 1], [], []>} : vector<8x128xf32>, vector<128x128xf32>, vector<8x128xf32> -> vector<8x128xf32>
      %39 = arith.addf %0, %38 : vector<8x128xf32>
      %cst_14 = arith.constant -6.000000e-01 : f32
      %40 = vector.broadcast %cst_14 : f32 to vector<8x128xf32>
      %41 = arith.mulf %40, %35 : vector<8x128xf32>
      %42 = arith.addf %39, %41 : vector<8x128xf32>
      %43 = arith.addf %42, %36 : vector<8x128xf32>
      %44 = arith.minimumf %4, %43 : vector<8x128xf32>
      %45 = arith.subf %43, %44 : vector<8x128xf32>
      scf.yield %44, %45 : vector<8x128xf32>, vector<8x128xf32>
    }
    %8 = arith.subf %7#0, %7#1 : vector<8x128xf32>
    %c0_5 = arith.constant 0 : index
    %c0_6 = arith.constant 0 : index
    %9 = vector.load %arg4[%c0_5, %c0_6] : memref<8x128xf32, #tpu.memory_space<vmem>>, vector<8x128xf32>
    tpu.vector_store %arg4[%c0_5, %c0_6], %8 {strides = array<i32>} : memref<8x128xf32, #tpu.memory_space<vmem>>, vector<8x128xf32>,
    return
  }
  func.func @transform_0(%arg0: i32) -> (i32, i32) {
    %c0_i32 = arith.constant 0 : i32
    %c0_i32_0 = arith.constant 0 : i32
    return %arg0, %c0_i32 : i32, i32
  }
  func.func @transform_1(%arg0: i32) -> (i32, i32) {
    %c0_i32 = arith.constant 0 : i32
    %c0_i32_0 = arith.constant 0 : i32
    %c0_i32_1 = arith.constant 0 : i32
    return %c0_i32, %c0_i32_0 : i32, i32
  }
  func.func @transform_2(%arg0: i32) -> (i32, i32) {
    %c0_i32 = arith.constant 0 : i32
    %c0_i32_0 = arith.constant 0 : i32
    %c0_i32_1 = arith.constant 0 : i32
    return %c0_i32, %c0_i32_0 : i32, i32
  }
  func.func @transform_3(%arg0: i32) -> (i32, i32) {
    %c0_i32 = arith.constant 0 : i32
    %c0_i32_0 = arith.constant 0 : i32
    return %arg0, %c0_i32 : i32, i32
  }
}

</mosaic_0001>

<bundles_post_ra>
// kernel: tpu_custom_call.1
= control target key start
LH: loop header
LB: loop body
LE: loop exit
PB: predicated region body
PF: predicated region fallthrough
CT: control target
= control target key end

     0   :  { %8 = vsyncpa [#allocation3], 0  ;;  %s517_s0 = inlined_call_operand.hbm [shape: f32[8,128], index: 0, kind: input, shape index: {}]   ;;  %s518_s1 = inlined_call_operand.hbm [shape: f32[128,128], index: 1, kind: input, shape index: {}]   ;;  %s519_s2 = inlined_call_operand.vmem [shape: f32[1,128], index: 2, kind: input, shape index: {}]   ;;  %s520_s3 = inlined_call_operand.hbm [shape: f32[8,128], index: 3, kind: output, shape index: {}]  }
   0x1   :  { %9 = vsyncpa [#allocation6], 0 }
   0x2   :  { %10 = vsyncpa [#allocation4], 0  ;;  %s16_s14 = sshll.u32 %s517_s0, 4  ;;  %s345_s15 = smov [#allocation2]   ;;  %s17_s14 = int_to_ptr.hbm [resolvable:$true] %s16_s14 }
   0x3   :  { %s18_s16 = sshll.u32 %s345_s15, 4  ;;  %s26_s19 = sshll.u32 %s518_s1, 4  ;;  %s19_s16 = int_to_ptr.vmem [resolvable:$true] %s18_s16  ;;  %s27_s19 = int_to_ptr.hbm [resolvable:$true] %s26_s19 }
   0x4   :  { %21 = dma.hbm_to_vmem [thread:$0]  %s17_s14, 128, %s19_s16, [#allocation3]  }
   0x5   :  { %s346_s20 = smov [#allocation5]   ;;  %s347_s22 = smov 128  }
   0x6   :  { %s28_s21 = sshll.u32 %s346_s20, 4  ;;  %s348_s23 = smov 8   ;;  %s29_s21 = int_to_ptr.vmem [resolvable:$true] %s28_s21 }
   0x7   :  { %34 = dma.hbm_to_vmem [thread:$0]  %s27_s19, 2048, %s29_s21, [#allocation6], %s347_s22, %s347_s22, %s348_s23  }
   0x8   :  { %327 = dma.done.wait [#allocation3], 128  }
   0x9   :  { %328 = vsyncadd [#allocation3], 4294967168 }
   0xa   :  { %329 = dma.done.wait [#allocation6], 2048  }
   0xb   :  { %330 = vsyncadd [#allocation6], 4294965248  ;;  %v376_v0 = vld [vmem:[#allocation2] sm:$0xff]  ;;  %v378_v1 = vld [vmem:[#allocation5] sm:$0xff]  ;;  %v415_v18 = vmov 0.0   ;;  %s420_s24 = smov 0  }
   0xc   :  { %v380_v2 = vld [vmem:[#allocation5 + $0x8] sm:$0xff]  ;;  %v382_v3 = vld [vmem:[#allocation5 + $0x10] sm:$0xff]  ;;  %v384_v4 = vld [vmem:[#allocation5 + $0x18] sm:$0xff] }
   0xd   :  { %v386_v5 = vld [vmem:[#allocation5 + $0x20] sm:$0xff]  ;;  %v388_v6 = vld [vmem:[#allocation5 + $0x28] sm:$0xff]  ;;  %v390_v7 = vld [vmem:[#allocation5 + $0x30] sm:$0xff] }
   0xe   :  { %v392_v8 = vld [vmem:[#allocation5 + $0x38] sm:$0xff]  ;;  %v394_v9 = vld [vmem:[#allocation5 + $0x40] sm:$0xff]  ;;  %v396_v10 = vld [vmem:[#allocation5 + $0x48] sm:$0xff] }
   0xf   :  { %v398_v11 = vld [vmem:[#allocation5 + $0x50] sm:$0xff]  ;;  %v400_v12 = vld [vmem:[#allocation5 + $0x58] sm:$0xff]  ;;  %v402_v13 = vld [vmem:[#allocation5 + $0x60] sm:$0xff] }
  0x10   :  { %v404_v14 = vld [vmem:[#allocation5 + $0x68] sm:$0xff]  ;;  %v406_v15 = vld [vmem:[#allocation5 + $0x70] sm:$0xff]  ;;  %v408_v16 = vld [vmem:[#allocation5 + $0x78] sm:$0xff] }
  0x11   :  { %v413_v17 = vld [vmem:[%s519_s2] ss:$0 sm:$0xff]  }
  0x12   :  { %v521_v19 = vmov %v413_v17 }
  0x13 LB: > { %75 = vmatpush.msra.mxu0 %v408_v16  ;;  %102 = vmatpush.msra.mxu1 %v408_v16  ;;  %v74_v20 = vsub.f32 %v339_v19, %v335_v18  ;;  %v96_v21 = vmul.f32 -0.6, %v339_v19  ;;  %s71_s24 = sadd.s32 1, %s343_s24   ;;  %s343_s24 = sphi %s420_s24, %s71_s24   ;;  %v339_v19 = vphi %v521_v19, %v523_v19   ;;  %v335_v18 = vphi %v415_v18, %v522_v18  }
  0x14   : > { %129 = vmatpush.msra.mxu2 %v408_v16  ;;  %156 = vmatpush.msra.mxu3 %v408_v16  ;;  %p68_p0 = scmp.ge.s32.totalorder %s71_s24, 250  }
  0x15   : > { %76 = vmatpush.msra.mxu0 %v406_v15  ;;  %103 = vmatpush.msra.mxu1 %v406_v15  ;;  %s191_s26 = sshll.u32 (%p68_p0), %s520_s3, 4  ;;  %s349_s27 = smov (%p68_p0), [#allocation7]   ;;  %s192_s26 = int_to_ptr.hbm [resolvable:$true] %s191_s26 }
  0x16   : > { %130 = vmatpush.msra.mxu2 %v406_v15  ;;  %157 = vmatpush.msra.mxu3 %v406_v15  ;;  %s189_s28 = sshll.u32 (%p68_p0), %s349_s27, 4  ;;  %s190_s28 = int_to_ptr.vmem [resolvable:$true] %s189_s28 }
  0x17   : > { %77 = vmatpush.msra.mxu0 %v404_v14  ;;  %104 = vmatpush.msra.mxu1 %v404_v14 }
  0x18   : > { %131 = vmatpush.msra.mxu2 %v404_v14  ;;  %158 = vmatpush.msra.mxu3 %v404_v14 }
  0x19   : > { %78 = vmatpush.msra.mxu0 %v402_v13  ;;  %105 = vmatpush.msra.mxu1 %v402_v13 }
  0x1a   : > { %132 = vmatpush.msra.mxu2 %v402_v13  ;;  %159 = vmatpush.msra.mxu3 %v402_v13 }
  0x1b   : > { %79 = vmatpush.msra.mxu0 %v400_v12  ;;  %106 = vmatpush.msra.mxu1 %v400_v12 }
  0x1c   : > { %133 = vmatpush.msra.mxu2 %v400_v12  ;;  %160 = vmatpush.msra.mxu3 %v400_v12 }
  0x1d   : > { %80 = vmatpush.msra.mxu0 %v398_v11  ;;  %107 = vmatpush.msra.mxu1 %v398_v11 }
  0x1e   : > { %134 = vmatpush.msra.mxu2 %v398_v11  ;;  %161 = vmatpush.msra.mxu3 %v398_v11 }
  0x1f   : > { %81 = vmatpush.msra.mxu0 %v396_v10  ;;  %108 = vmatpush.msra.mxu1 %v396_v10 }
  0x20   : > { %135 = vmatpush.msra.mxu2 %v396_v10  ;;  %162 = vmatpush.msra.mxu3 %v396_v10 }
  0x21   : > { %82 = vmatpush.msra.mxu0 %v394_v9  ;;  %109 = vmatpush.msra.mxu1 %v394_v9 }
  0x22   : > { %136 = vmatpush.msra.mxu2 %v394_v9  ;;  %163 = vmatpush.msra.mxu3 %v394_v9 }
  0x23   : > { %83 = vmatpush.msra.mxu0 %v392_v8  ;;  %110 = vmatpush.msra.mxu1 %v392_v8 }
  0x24   : > { %137 = vmatpush.msra.mxu2 %v392_v8  ;;  %164 = vmatpush.msra.mxu3 %v392_v8 }
  0x25   : > { %84 = vmatpush.msra.mxu0 %v390_v7  ;;  %111 = vmatpush.msra.mxu1 %v390_v7 }
  0x26   : > { %138 = vmatpush.msra.mxu2 %v390_v7  ;;  %165 = vmatpush.msra.mxu3 %v390_v7 }
  0x27   : > { %85 = vmatpush.msra.mxu0 %v388_v6  ;;  %112 = vmatpush.msra.mxu1 %v388_v6 }
  0x28   : > { %139 = vmatpush.msra.mxu2 %v388_v6  ;;  %166 = vmatpush.msra.mxu3 %v388_v6 }
  0x29   : > { %86 = vmatpush.msra.mxu0 %v386_v5  ;;  %113 = vmatpush.msra.mxu1 %v386_v5 }
  0x2a   : > { %140 = vmatpush.msra.mxu2 %v386_v5  ;;  %167 = vmatpush.msra.mxu3 %v386_v5 }
  0x2b   : > { %87 = vmatpush.msra.mxu0 %v384_v4  ;;  %114 = vmatpush.msra.mxu1 %v384_v4 }
  0x2c   : > { %141 = vmatpush.msra.mxu2 %v384_v4  ;;  %168 = vmatpush.msra.mxu3 %v384_v4 }
  0x2d   : > { %88 = vmatpush.msra.mxu0 %v382_v3  ;;  %115 = vmatpush.msra.mxu1 %v382_v3 }
  0x2e   : > { %142 = vmatpush.msra.mxu2 %v382_v3  ;;  %169 = vmatpush.msra.mxu3 %v382_v3 }
  0x2f   : > { %89 = vmatpush.msra.mxu0 %v380_v2  ;;  %116 = vmatpush.msra.mxu1 %v380_v2 }
  0x30   : > { %143 = vmatpush.msra.mxu2 %v380_v2  ;;  %170 = vmatpush.msra.mxu3 %v380_v2 }
  0x31   : > { %90 = vmatpush.msra.mxu0 %v378_v1  ;;  %117 = vmatpush.msra.mxu1 %v378_v1 }
  0x32   : > { %91 = vmatmul.f32.vlgmr.msra.gmra.mxu0 %v74_v20  ;;  %144 = vmatpush.msra.mxu2 %v378_v1 }
  0x33   : > { %171 = vmatpush.msra.mxu3 %v378_v1 }
  0xaf   : > { %v92_v22 = vpop.f32.mrf.mxu0 }
  0xb0   : > { %v95_v23 = vadd.f32 %v92_v22, %v376_v0 }
  0xb2   : > { %v97_v24 = vadd.f32 %v96_v21, %v95_v23 }
  0xb4   : > { %v98_v25 = vadd.f32 %v335_v18, %v97_v24 }
  0xb6   : > { %v99_v26 = vmin.f32 %v413_v17, %v98_v25 }
  0xb8   : > { %v100_v27 = vsub.f32 %v98_v25, %v99_v26  ;;  %v123_v31 = vmul.f32 -0.6, %v99_v26 }
  0xba   : > { %v101_v28 = vsub.f32 %v99_v26, %v100_v27 }
  0xbc   : > { %118 = vmatmul.f32.vlgmr.msra.gmra.mxu1 %v101_v28 }
 0x139   : > { %v119_v29 = vpop.f32.mrf.mxu1 }
 0x13a   : > { %v122_v30 = vadd.f32 %v119_v29, %v376_v0 }
 0x13c   : > { %v124_v32 = vadd.f32 %v123_v31, %v122_v30 }
 0x13e   : > { %v125_v33 = vadd.f32 %v124_v32, %v100_v27 }
 0x140   : > { %v126_v34 = vmin.f32 %v413_v17, %v125_v33 }
 0x142   : > { %v127_v35 = vsub.f32 %v125_v33, %v126_v34  ;;  %v150_v39 = vmul.f32 -0.6, %v126_v34 }
 0x144   : > { %v128_v36 = vsub.f32 %v126_v34, %v127_v35 }
 0x146   : > { %145 = vmatmul.f32.vlgmr.msra.gmra.mxu2 %v128_v36 }
 0x1c9   : > { %v146_v37 = vpop.f32.mrf.mxu2 }
 0x1ca   : > { %v149_v38 = vadd.f32 %v146_v37, %v376_v0 }
 0x1cc   : > { %v151_v40 = vadd.f32 %v150_v39, %v149_v38 }
 0x1ce   : > { %v152_v41 = vadd.f32 %v151_v40, %v127_v35 }
 0x1d0   : > { %v153_v42 = vmin.f32 %v413_v17, %v152_v41 }
 0x1d2   : > { %v154_v43 = vsub.f32 %v152_v41, %v153_v42  ;;  %v177_v47 = vmul.f32 -0.6, %v153_v42 }
 0x1d4   : > { %v155_v44 = vsub.f32 %v153_v42, %v154_v43 }
 0x1d6   : > { %172 = vmatmul.f32.vlgmr.msra.gmra.mxu3 %v155_v44 }
 0x259   : > { %v173_v45 = vpop.f32.mrf.mxu3 }
 0x25a   : > { %v176_v46 = vadd.f32 %v173_v45, %v376_v0 }
 0x25c   : > { %v178_v48 = vadd.f32 %v177_v47, %v176_v46 }
 0x25e   : > { %v179_v49 = vadd.f32 %v178_v48, %v154_v43 }
 0x260   : > { %v180_v50 = vmin.f32 %v413_v17, %v179_v49   ;;  %70 = sbr.rel (!%p68_p0) target bundleno = 19 (0x13), region = 47 }
 0x262   : > { %v181_v51 = vsub.f32 %v179_v49, %v180_v50   ;;  %v523_v19 = vmov %v180_v50 }
 0x264   : > { %v522_v18 = vmov %v181_v51  ;;  %v182_v52 = vsub.f32 (%p68_p0), %v180_v50, %v181_v51 }
 0x266   :  { %183 = vst [vmem:[#allocation7] sm:$0xff] %v182_v52 }
 0x267   :  { %194 = dma.vmem_to_hbm [thread:$0]  %s190_s28, 128, %s192_s26, [#allocation4]  }
 0x268   :  { %331 = dma.done.wait [#allocation4], 128  }
 0x269   :  { %332 = vsyncadd [#allocation4], 4294967168 }
 0x26a   :  { %199 = vsyncpa [#allocation3], 1 }
 0x26b   :  { %200 = vsyncpa [#allocation6], 1 }
 0x26c   :  { %201 = vsyncpa [#allocation4], 1 }

// kernel: tpu_custom_call.1
= control target key start
LH: loop header
LB: loop body
LE: loop exit
PB: predicated region body
PF: predicated region fallthrough
CT: control target
= control target key end

     0   :  { %8 = vsyncpa [#allocation3], 0  ;;  %s517_s0 = inlined_call_operand.hbm [shape: f32[8,128], index: 0, kind: input, shape index: {}]   ;;  %s518_s1 = inlined_call_operand.hbm [shape: f32[128,128], index: 1, kind: input, shape index: {}]   ;;  %s519_s2 = inlined_call_operand.vmem [shape: f32[1,128], index: 2, kind: input, shape index: {}]   ;;  %s520_s3 = inlined_call_operand.hbm [shape: f32[8,128], index: 3, kind: output, shape index: {}]  }
   0x1   :  { %9 = vsyncpa [#allocation6], 0 }
   0x2   :  { %10 = vsyncpa [#allocation4], 0  ;;  %s16_s14 = sshll.u32 %s517_s0, 4  ;;  %s345_s15 = smov [#allocation2]   ;;  %s17_s14 = int_to_ptr.hbm [resolvable:$true] %s16_s14 }
   0x3   :  { %s18_s16 = sshll.u32 %s345_s15, 4  ;;  %s26_s19 = sshll.u32 %s518_s1, 4  ;;  %s19_s16 = int_to_ptr.vmem [resolvable:$true] %s18_s16  ;;  %s27_s19 = int_to_ptr.hbm [resolvable:$true] %s26_s19 }
   0x4   :  { %21 = dma.hbm_to_vmem [thread:$0]  %s17_s14, 128, %s19_s16, [#allocation3]  }
   0x5   :  { %s346_s20 = smov [#allocation5]   ;;  %s347_s22 = smov 128  }
   0x6   :  { %s28_s21 = sshll.u32 %s346_s20, 4  ;;  %s348_s23 = smov 8   ;;  %s29_s21 = int_to_ptr.vmem [resolvable:$true] %s28_s21 }
   0x7   :  { %34 = dma.hbm_to_vmem [thread:$0]  %s27_s19, 2048, %s29_s21, [#allocation6], %s347_s22, %s347_s22, %s348_s23  }
   0x8   :  { %327 = dma.done.wait [#allocation3], 128  }
   0x9   :  { %328 = vsyncadd [#allocation3], 4294967168 }
   0xa   :  { %329 = dma.done.wait [#allocation6], 2048  }
   0xb   :  { %330 = vsyncadd [#allocation6], 4294965248  ;;  %v376_v0 = vld [vmem:[#allocation2] sm:$0xff]  ;;  %v378_v1 = vld [vmem:[#allocation5] sm:$0xff]  ;;  %v415_v18 = vmov 0.0   ;;  %s420_s24 = smov 0  }
   0xc   :  { %v380_v2 = vld [vmem:[#allocation5 + $0x8] sm:$0xff]  ;;  %v382_v3 = vld [vmem:[#allocation5 + $0x10] sm:$0xff]  ;;  %v384_v4 = vld [vmem:[#allocation5 + $0x18] sm:$0xff] }
   0xd   :  { %v386_v5 = vld [vmem:[#allocation5 + $0x20] sm:$0xff]  ;;  %v388_v6 = vld [vmem:[#allocation5 + $0x28] sm:$0xff]  ;;  %v390_v7 = vld [vmem:[#allocation5 + $0x30] sm:$0xff] }
   0xe   :  { %v392_v8 = vld [vmem:[#allocation5 + $0x38] sm:$0xff]  ;;  %v394_v9 = vld [vmem:[#allocation5 + $0x40] sm:$0xff]  ;;  %v396_v10 = vld [vmem:[#allocation5 + $0x48] sm:$0xff] }
   0xf   :  { %v398_v11 = vld [vmem:[#allocation5 + $0x50] sm:$0xff]  ;;  %v400_v12 = vld [vmem:[#allocation5 + $0x58] sm:$0xff]  ;;  %v402_v13 = vld [vmem:[#allocation5 + $0x60] sm:$0xff] }
  0x10   :  { %v404_v14 = vld [vmem:[#allocation5 + $0x68] sm:$0xff]  ;;  %v406_v15 = vld [vmem:[#allocation5 + $0x70] sm:$0xff]  ;;  %v408_v16 = vld [vmem:[#allocation5 + $0x78] sm:$0xff] }
  0x11   :  { %v413_v17 = vld [vmem:[%s519_s2] ss:$0 sm:$0xff]  }
  0x12   :  { %v521_v19 = vmov %v413_v17 }
  0x13 LB: > { %75 = vmatpush.msra.mxu0 %v408_v16  ;;  %102 = vmatpush.msra.mxu1 %v408_v16  ;;  %v74_v20 = vsub.f32 %v339_v19, %v335_v18  ;;  %v96_v21 = vmul.f32 -0.6, %v339_v19  ;;  %s71_s24 = sadd.s32 1, %s343_s24   ;;  %s343_s24 = sphi %s420_s24, %s71_s24   ;;  %v339_v19 = vphi %v521_v19, %v523_v19   ;;  %v335_v18 = vphi %v415_v18, %v522_v18  }
  0x14   : > { %129 = vmatpush.msra.mxu2 %v408_v16  ;;  %156 = vmatpush.msra.mxu3 %v408_v16  ;;  %p68_p0 = scmp.ge.s32.totalorder %s71_s24, 250  }
  0x15   : > { %76 = vmatpush.msra.mxu0 %v406_v15  ;;  %103 = vmatpush.msra.mxu1 %v406_v15  ;;  %s191_s26 = sshll.u32 (%p68_p0), %s520_s3, 4  ;;  %s349_s27 = smov (%p68_p0), [#allocation7]   ;;  %s192_s26 = int_to_ptr.hbm [resolvable:$true] %s191_s26 }
  0x16   : > { %130 = vmatpush.msra.mxu2 %v406_v15  ;;  %157 = vmatpush.msra.mxu3 %v406_v15  ;;  %s189_s28 = sshll.u32 (%p68_p0), %s349_s27, 4  ;;  %s190_s28 = int_to_ptr.vmem [resolvable:$true] %s189_s28 }
  0x17   : > { %77 = vmatpush.msra.mxu0 %v404_v14  ;;  %104 = vmatpush.msra.mxu1 %v404_v14 }
  0x18   : > { %131 = vmatpush.msra.mxu2 %v404_v14  ;;  %158 = vmatpush.msra.mxu3 %v404_v14 }
  0x19   : > { %78 = vmatpush.msra.mxu0 %v402_v13  ;;  %105 = vmatpush.msra.mxu1 %v402_v13 }
  0x1a   : > { %132 = vmatpush.msra.mxu2 %v402_v13  ;;  %159 = vmatpush.msra.mxu3 %v402_v13 }
  0x1b   : > { %79 = vmatpush.msra.mxu0 %v400_v12  ;;  %106 = vmatpush.msra.mxu1 %v400_v12 }
  0x1c   : > { %133 = vmatpush.msra.mxu2 %v400_v12  ;;  %160 = vmatpush.msra.mxu3 %v400_v12 }
  0x1d   : > { %80 = vmatpush.msra.mxu0 %v398_v11  ;;  %107 = vmatpush.msra.mxu1 %v398_v11 }
  0x1e   : > { %134 = vmatpush.msra.mxu2 %v398_v11  ;;  %161 = vmatpush.msra.mxu3 %v398_v11 }
  0x1f   : > { %81 = vmatpush.msra.mxu0 %v396_v10  ;;  %108 = vmatpush.msra.mxu1 %v396_v10 }
  0x20   : > { %135 = vmatpush.msra.mxu2 %v396_v10  ;;  %162 = vmatpush.msra.mxu3 %v396_v10 }
  0x21   : > { %82 = vmatpush.msra.mxu0 %v394_v9  ;;  %109 = vmatpush.msra.mxu1 %v394_v9 }
  0x22   : > { %136 = vmatpush.msra.mxu2 %v394_v9  ;;  %163 = vmatpush.msra.mxu3 %v394_v9 }
  0x23   : > { %83 = vmatpush.msra.mxu0 %v392_v8  ;;  %110 = vmatpush.msra.mxu1 %v392_v8 }
  0x24   : > { %137 = vmatpush.msra.mxu2 %v392_v8  ;;  %164 = vmatpush.msra.mxu3 %v392_v8 }
  0x25   : > { %84 = vmatpush.msra.mxu0 %v390_v7  ;;  %111 = vmatpush.msra.mxu1 %v390_v7 }
  0x26   : > { %138 = vmatpush.msra.mxu2 %v390_v7  ;;  %165 = vmatpush.msra.mxu3 %v390_v7 }
  0x27   : > { %85 = vmatpush.msra.mxu0 %v388_v6  ;;  %112 = vmatpush.msra.mxu1 %v388_v6 }
  0x28   : > { %139 = vmatpush.msra.mxu2 %v388_v6  ;;  %166 = vmatpush.msra.mxu3 %v388_v6 }
  0x29   : > { %86 = vmatpush.msra.mxu0 %v386_v5  ;;  %113 = vmatpush.msra.mxu1 %v386_v5 }
  0x2a   : > { %140 = vmatpush.msra.mxu2 %v386_v5  ;;  %167 = vmatpush.msra.mxu3 %v386_v5 }
  0x2b   : > { %87 = vmatpush.msra.mxu0 %v384_v4  ;;  %114 = vmatpush.msra.mxu1 %v384_v4 }
  0x2c   : > { %141 = vmatpush.msra.mxu2 %v384_v4  ;;  %168 = vmatpush.msra.mxu3 %v384_v4 }
  0x2d   : > { %88 = vmatpush.msra.mxu0 %v382_v3  ;;  %115 = vmatpush.msra.mxu1 %v382_v3 }
  0x2e   : > { %142 = vmatpush.msra.mxu2 %v382_v3  ;;  %169 = vmatpush.msra.mxu3 %v382_v3 }
  0x2f   : > { %89 = vmatpush.msra.mxu0 %v380_v2  ;;  %116 = vmatpush.msra.mxu1 %v380_v2 }
  0x30   : > { %143 = vmatpush.msra.mxu2 %v380_v2  ;;  %170 = vmatpush.msra.mxu3 %v380_v2 }
  0x31   : > { %90 = vmatpush.msra.mxu0 %v378_v1  ;;  %117 = vmatpush.msra.mxu1 %v378_v1 }
  0x32   : > { %91 = vmatmul.f32.vlgmr.msra.gmra.mxu0 %v74_v20  ;;  %144 = vmatpush.msra.mxu2 %v378_v1 }
  0x33   : > { %171 = vmatpush.msra.mxu3 %v378_v1 }
  0xaf   : > { %v92_v22 = vpop.f32.mrf.mxu0 }
  0xb0   : > { %v95_v23 = vadd.f32 %v92_v22, %v376_v0 }
  0xb2   : > { %v97_v24 = vadd.f32 %v96_v21, %v95_v23 }
  0xb4   : > { %v98_v25 = vadd.f32 %v335_v18, %v97_v24 }
  0xb6   : > { %v99_v26 = vmin.f32 %v413_v17, %v98_v25 }
  0xb8   : > { %v100_v27 = vsub.f32 %v98_v25, %v99_v26  ;;  %v123_v31 = vmul.f32 -0.6, %v99_v26 }
  0xba   : > { %v101_v28 = vsub.f32 %v99_v26, %v100_v27 }
  0xbc   : > { %118 = vmatmul.f32.vlgmr.msra.gmra.mxu1 %v101_v28 }
 0x139   : > { %v119_v29 = vpop.f32.mrf.mxu1 }
 0x13a   : > { %v122_v30 = vadd.f32 %v119_v29, %v376_v0 }
 0x13c   : > { %v124_v32 = vadd.f32 %v123_v31, %v122_v30 }
 0x13e   : > { %v125_v33 = vadd.f32 %v124_v32, %v100_v27 }
 0x140   : > { %v126_v34 = vmin.f32 %v413_v17, %v125_v33 }
 0x142   : > { %v127_v35 = vsub.f32 %v125_v33, %v126_v34  ;;  %v150_v39 = vmul.f32 -0.6, %v126_v34 }
 0x144   : > { %v128_v36 = vsub.f32 %v126_v34, %v127_v35 }
 0x146   : > { %145 = vmatmul.f32.vlgmr.msra.gmra.mxu2 %v128_v36 }
 0x1c9   : > { %v146_v37 = vpop.f32.mrf.mxu2 }
 0x1ca   : > { %v149_v38 = vadd.f32 %v146_v37, %v376_v0 }
 0x1cc   : > { %v151_v40 = vadd.f32 %v150_v39, %v149_v38 }
 0x1ce   : > { %v152_v41 = vadd.f32 %v151_v40, %v127_v35 }
 0x1d0   : > { %v153_v42 = vmin.f32 %v413_v17, %v152_v41 }
 0x1d2   : > { %v154_v43 = vsub.f32 %v152_v41, %v153_v42  ;;  %v177_v47 = vmul.f32 -0.6, %v153_v42 }
 0x1d4   : > { %v155_v44 = vsub.f32 %v153_v42, %v154_v43 }
 0x1d6   : > { %172 = vmatmul.f32.vlgmr.msra.gmra.mxu3 %v155_v44 }
 0x259   : > { %v173_v45 = vpop.f32.mrf.mxu3 }
 0x25a   : > { %v176_v46 = vadd.f32 %v173_v45, %v376_v0 }
 0x25c   : > { %v178_v48 = vadd.f32 %v177_v47, %v176_v46 }
 0x25e   : > { %v179_v49 = vadd.f32 %v178_v48, %v154_v43 }
 0x260   : > { %v180_v50 = vmin.f32 %v413_v17, %v179_v49   ;;  %70 = sbr.rel (!%p68_p0) target bundleno = 19 (0x13), region = 47 }
 0x262   : > { %v181_v51 = vsub.f32 %v179_v49, %v180_v50   ;;  %v523_v19 = vmov %v180_v50 }
 0x264   : > { %v522_v18 = vmov %v181_v51  ;;  %v182_v52 = vsub.f32 (%p68_p0), %v180_v50, %v181_v51 }
 0x266   :  { %183 = vst [vmem:[#allocation7] sm:$0xff] %v182_v52 }
 0x267   :  { %194 = dma.vmem_to_hbm [thread:$0]  %s190_s28, 128, %s192_s26, [#allocation4]  }
 0x268   :  { %331 = dma.done.wait [#allocation4], 128  }
 0x269   :  { %332 = vsyncadd [#allocation4], 4294967168 }
 0x26a   :  { %199 = vsyncpa [#allocation3], 1 }
 0x26b   :  { %200 = vsyncpa [#allocation6], 1 }
 0x26c   :  { %201 = vsyncpa [#allocation4], 1 }

</bundles_post_ra>
